<compile_context>
chip_gen: v7x
topology: tpu7x:2x2x1
jax: 0.10.0
libtpu: 0.0.40
codegen_flags: <defaults>
</compile_context>

<pallas_src>
import functools
import math

import jax
import jax.numpy as jnp
from jax import lax
from jax.experimental import pallas as pl
from jax.experimental.pallas import tpu as pltpu


_EPS = 1e-15  # same epsilon as the PyTorch reference


def _round_up(x, m):
    return (x + m - 1) // m * m


def _pad2(a, rows, cols):
    return jnp.pad(a, ((0, rows - a.shape[0]), (0, cols - a.shape[1])))


def _stable_sigmoid(x):
    # Numerically safe logistic: finite (and NaN-free) for any finite input.
    z = jnp.exp(-jnp.abs(x))
    return jnp.where(x >= 0, 1.0 / (1.0 + z), z / (1.0 + z))


def fused_pretrain_kernel(
    pos_ref, neg_ref,                      # SMEM int32 (2, E_pos) / (2, E_neg)
    l_feat_ref, r_raw_ref,                 # VMEM f32 (Nl, D) / (Nr, R)
    net_ref, net_t_ref,                    # VMEM bf16 (Nl, Nr) / (Nr, Nl)
    lin1_w_ref, lin1_b_ref,                # VMEM bf16 (R, D) / f32 (1, D)
    w1_ref, b1_ref,                        # conv1 fused: bf16 (2D, H) / f32 (1, H)
    w2_ref, b2_ref,                        # conv2 fused: bf16 (2H, D) / f32 (1, D)
    l_node_ref, r_node_ref, loss_ref,      # outputs: (Nl, D), (Nr, D), (1, 1)
    *, nl: int, hop: int,
):
    f32 = jnp.float32
    bf16 = jnp.bfloat16

    net = net_ref[...]       # bf16, loaded once
    net_t = net_t_ref[...]   # bf16, pre-transposed in HBM

    # pretrain.lin1 (bf16 MXU operands, f32 accumulation)
    r_feature = (
        jnp.dot(r_raw_ref[...].astype(bf16), lin1_w_ref[...],
                preferred_element_type=f32)
        + lin1_b_ref[...]
    )

    # Stacked node state: rows [0, nl) are the l side, rows [nl, nl+nr) the r side.
    x_init = jnp.concatenate([l_feat_ref[...], r_feature], axis=0)   # (N, D) f32

    def graph_inception(x_in, w_ref, b_ref):
        # graph_inception.forward, eval mode (dropout == identity).
        # Per hop: one aggregation per side (net @ x_r, net.T @ x_l), then ONE fused
        # projection  [K | K*x] @ [w_unit; w_mul] + (b1+b2)  replacing the reference's
        # four Linear calls; Korder update K <- K + K*x == K*(1+x).
        w = w_ref[...]                       # bf16, cast hoisted to the wrapper
        b = b_ref[...]                       # f32 (1, Dout), b1+b2 pre-summed
        n_tot = x_in.shape[0]
        d_out = w.shape[1]

        def hop_body(x, acc):
            xb = x.astype(bf16)                                        # one cast / hop
            k_l = jnp.dot(net, xb[nl:, :], preferred_element_type=f32)    # net_l @ x0
            k_r = jnp.dot(net_t, xb[:nl, :], preferred_element_type=f32)  # net_r @ x1
            k = jnp.concatenate([k_l, k_r], axis=0)                    # (N, Din) f32
            mul = k * x                                                # Multiply() input
            proj_in = jnp.concatenate([k, mul], axis=1).astype(bf16)   # (N, 2*Din)
            rel = jnp.dot(proj_in, w, preferred_element_type=f32) + b  # lin1(K)+lin2(K*x)
            return k + mul, acc + rel

        acc0 = jnp.zeros((n_tot, d_out), f32)
        if hop <= 4:
            x, acc = x_in, acc0
            for _ in range(hop):
                x, acc = hop_body(x, acc)
        else:
            x, acc = lax.fori_loop(0, hop, lambda i, c: hop_body(*c), (x_in, acc0))
        return acc

    # layers.forward
    h1 = jnp.maximum(graph_inception(x_init, w1_ref, b1_ref), 0.0)
    h2 = jnp.maximum(graph_inception(h1, w2_ref, b2_ref), 0.0)
    out = h2 + x_init                      # l_node = y2 + l_feat ; r_node = z2 + r_feature

    l_node_ref[...] = out[:nl, :]
    r_node_ref[...] = out[nl:, :]

    # pos / neg edge loss: index-based row gathers from the VMEM-resident outputs
    # (SMEM scalar indices + dynamic sublane slices) -- no one-hot matmuls.
    def edge_loss(idx_ref, is_neg):
        n_e = idx_ref.shape[1]

        def body(e, acc):
            li = idx_ref[0, e]
            ri = idx_ref[1, e]
            lrow = l_node_ref[pl.ds(li, 1), :]        # (1, D)
            rrow = r_node_ref[pl.ds(ri, 1), :]        # (1, D)
            s = jnp.sum(lrow * rrow)                  # padded cols are zero -> exact
            p = _stable_sigmoid(s)
            q = (1.0 - p) if is_neg else p
            return acc - jnp.log(q + _EPS)

        total = lax.fori_loop(0, n_e, body, jnp.zeros((), f32))
        return total / n_e

    pos_loss = edge_loss(pos_ref, False)
    neg_loss = edge_loss(neg_ref, True)
    loss_ref[...] = jnp.full((1, 1), 0.5 * (pos_loss + neg_loss), dtype=f32)


def pretrain_fwd(params, l_feat, r_feat, network, edge_index, neg_index, hop):
    nl, d_in = l_feat.shape
    nr, r_dim = r_feat.shape
    assert network.shape == (nl, nr)

    w1a, b1a, w1b, b1b = params["conv1"]   # graph_inception(inputdims -> hiddendims)
    w2a, b2a, w2b, b2b = params["conv2"]   # graph_inception(hiddendims -> outputdims)
    d_hid = w1a.shape[1]
    d_out = w2a.shape[1]
    assert d_out == d_in, "residual l_node = z1 + l_feat requires outputdims == inputdims"

    # Lane-dense padded dims (zero padding is inert through the whole forward).
    D = _round_up(d_in, 128)
    H = _round_up(d_hid, 128)
    R = _round_up(r_dim, 128)

    f32, bf16 = jnp.float32, jnp.bfloat16

    l_feat_p = _pad2(l_feat.astype(f32), nl, D)
    r_raw_p = _pad2(r_feat.astype(f32), nr, R)

    lin1_w = _pad2(params["lin1_w"], R, D).astype(bf16)
    lin1_b = _pad2(params["lin1_b"], 1, D).astype(f32)

    # Fused projection weights: [w_unit ; w_mul] along the contraction dim, b1+b2.
    w1cat = jnp.concatenate([_pad2(w1a, D, H), _pad2(w1b, D, H)], axis=0).astype(bf16)
    b1sum = _pad2(b1a + b1b, 1, H).astype(f32)
    w2cat = jnp.concatenate([_pad2(w2a, H, D), _pad2(w2b, H, D)], axis=0).astype(bf16)
    b2sum = _pad2(b2a + b2b, 1, D).astype(f32)

    # Adjacency in bf16 (values exact) + HBM-side transpose (no in-kernel XLU transpose).
    net_bf = network.astype(bf16)
    net_t_bf = network.T.astype(bf16)

    pos_idx = edge_index.astype(jnp.int32)
    neg_idx = neg_index.astype(jnp.int32)
    e_pos = int(pos_idx.shape[1])
    e_neg = int(neg_idx.shape[1])

    vmem_inputs = (l_feat_p, r_raw_p, net_bf, net_t_bf,
                   lin1_w, lin1_b, w1cat, b1sum, w2cat, b2sum)
    n_tot = nl + nr
    out_bytes = (nl + nr) * D * 4 + 4
    io_bytes = sum(int(a.size) * a.dtype.itemsize for a in vmem_inputs) + out_bytes
    # Buffer sum + generous headroom for intermediates, capped at v7x physical VMEM.
    vmem_limit = int(min(64 * 1024 * 1024, max(32 * 1024 * 1024, 8 * io_bytes)))

    flops = 2 * nr * R * D                                   # pretrain.lin1
    flops += hop * (4 * nl * nr * D + 2 * n_tot * (2 * D) * H)   # conv1 hops
    flops += hop * (4 * nl * nr * H + 2 * n_tot * (2 * H) * D)   # conv2 hops
    flops += 2 * (e_pos + e_neg) * D                         # edge dot products
    cost = pl.CostEstimate(
        flops=int(flops),
        transcendentals=int(2 * (e_pos + e_neg)),
        bytes_accessed=int(io_bytes),
    )

    vmem = pl.BlockSpec(memory_space=pltpu.MemorySpace.VMEM)
    smem = pl.BlockSpec(memory_space=pltpu.MemorySpace.SMEM)

    kernel = functools.partial(fused_pretrain_kernel, nl=nl, hop=hop)
    l_node, r_node, loss = pl.pallas_call(
        kernel,
        out_shape=(
            jax.ShapeDtypeStruct((nl, D), f32),
            jax.ShapeDtypeStruct((nr, D), f32),
            jax.ShapeDtypeStruct((1, 1), f32),
        ),
        in_specs=[smem, smem] + [vmem] * len(vmem_inputs),
        out_specs=(vmem, vmem, vmem),
        compiler_params=pltpu.CompilerParams(vmem_limit_bytes=vmem_limit),
        cost_estimate=cost,
    )(pos_idx, neg_idx, *vmem_inputs)

    return loss[0, 0], l_node[:, :d_in], r_node[:, :d_in]


# PyTorch Linear default init: U(-1/sqrt(fan_in), 1/sqrt(fan_in)); weights stored
# pre-transposed as (in_features, out_features).
def init_linear(key, fan_in, fan_out):
    kw, kb = jax.random.split(key)
    bound = 1.0 / math.sqrt(fan_in)
    w = jax.random.uniform(kw, (fan_in, fan_out), jnp.float32, -bound, bound)
    b = jax.random.uniform(kb, (1, fan_out), jnp.float32, -bound, bound)
    return w, b


if __name__ == "__main__":
    # Small shapes consistent with the module. outputdims must equal inputdims
    # (required by `l_node = z1 + self.l_feat`).
    NL, NR = 16, 16
    INPUTDIMS, HIDDENDIMS, OUTPUTDIMS = 32, 16, 32
    HOP = 2
    R_RAW_DIM = 49       # pretrain.lin1 = Linear(49, inputdims)
    E_POS, E_NEG = 8, 8

    key = jax.random.PRNGKey(0)
    keys = jax.random.split(key, 12)

    # Moderate-scale inputs keep this forward numerically well-conditioned: the hop
    # recursion K*(1+x) is multiplicative, so unit-scale random features with an
    # unnormalized 0/1 adjacency drive the edge logits to +/-inf and the reference
    # loss itself goes non-finite. Scaled features + scaled adjacency avoid that.
    l_feat = 0.1 * jax.random.normal(keys[0], (NL, INPUTDIMS), jnp.float32)
    r_feat = 0.1 * jax.random.normal(keys[1], (NR, R_RAW_DIM), jnp.float32)
    network = 0.25 * (jax.random.uniform(keys[2], (NL, NR)) < 0.3).astype(jnp.float32)

    edge_index = jnp.stack(
        [
            jax.random.randint(keys[3], (E_POS,), 0, NL),
            jax.random.randint(keys[4], (E_POS,), 0, NR),
        ]
    )
    neg_index = jnp.stack(
        [
            jax.random.randint(keys[5], (E_NEG,), 0, NL),
            jax.random.randint(keys[6], (E_NEG,), 0, NR),
        ]
    )

    params = {}
    params["lin1_w"], params["lin1_b"] = init_linear(keys[7], R_RAW_DIM, INPUTDIMS)
    params["conv1"] = init_linear(keys[8], INPUTDIMS, HIDDENDIMS) + init_linear(
        keys[9], INPUTDIMS, HIDDENDIMS
    )
    params["conv2"] = init_linear(keys[10], HIDDENDIMS, OUTPUTDIMS) + init_linear(
        keys[11], HIDDENDIMS, OUTPUTDIMS
    )
    # TODO(synk): pretrain.lin2 = Linear(4, 19) is never used in forward() -> omitted.
    # TODO(synk): F.dropout implemented as identity (eval mode); training-mode dropout not modeled.

    r_loss, l_node, r_node = pretrain_fwd(
        params, l_feat, r_feat, network, edge_index, neg_index, HOP
    )
    jax.block_until_ready((r_loss, l_node, r_node))

    assert l_node.shape == (NL, OUTPUTDIMS)
    assert r_node.shape == (NR, OUTPUTDIMS)
    assert r_loss.shape == ()
    assert bool(jnp.all(jnp.isfinite(l_node)))
    assert bool(jnp.all(jnp.isfinite(r_node)))
    assert bool(jnp.isfinite(r_loss))
    print("KERNEL_OK")
</pallas_src>

<mosaic_0001>
module attributes {stable_mosaic.version = 11 : i64} {
  func.func @fused_pretrain_kernel(%arg0: memref<2x8xi32, #tpu.memory_space<smem>>, %arg1: memref<2x8xi32, #tpu.memory_space<smem>>, %arg2: memref<16x128xf32, #tpu.memory_space<vmem>>, %arg3: memref<16x128xf32, #tpu.memory_space<vmem>>, %arg4: memref<16x16xbf16, #tpu.memory_space<vmem>>, %arg5: memref<16x16xbf16, #tpu.memory_space<vmem>>, %arg6: memref<128x128xbf16, #tpu.memory_space<vmem>>, %arg7: memref<1x128xf32, #tpu.memory_space<vmem>>, %arg8: memref<256x128xbf16, #tpu.memory_space<vmem>>, %arg9: memref<1x128xf32, #tpu.memory_space<vmem>>, %arg10: memref<256x128xbf16, #tpu.memory_space<vmem>>, %arg11: memref<1x128xf32, #tpu.memory_space<vmem>>, %arg12: memref<16x128xf32, #tpu.memory_space<vmem>>, %arg13: memref<16x128xf32, #tpu.memory_space<vmem>>, %arg14: memref<1x1xf32, #tpu.memory_space<vmem>>) attributes {dimension_semantics = [], scalar_prefetch = 0 : i64, scratch_operands = 0 : i64, tpu.core_type = #tpu.core_type<tc>} {
    %c0 = arith.constant 0 : index
    %c0_0 = arith.constant 0 : index
    %0 = vector.load %arg4[%c0, %c0_0] : memref<16x16xbf16, #tpu.memory_space<vmem>>, vector<16x16xbf16>
    %c0_1 = arith.constant 0 : index
    %c0_2 = arith.constant 0 : index
    %1 = vector.load %arg5[%c0_1, %c0_2] : memref<16x16xbf16, #tpu.memory_space<vmem>>, vector<16x16xbf16>
    %c0_3 = arith.constant 0 : index
    %c0_4 = arith.constant 0 : index
    %2 = vector.load %arg3[%c0_3, %c0_4] : memref<16x128xf32, #tpu.memory_space<vmem>>, vector<16x128xf32>
    %3 = arith.truncf %2 : vector<16x128xf32> to vector<16x128xbf16>
    %c0_5 = arith.constant 0 : index
    %c0_6 = arith.constant 0 : index
    %4 = vector.load %arg6[%c0_5, %c0_6] : memref<128x128xbf16, #tpu.memory_space<vmem>>, vector<128x128xbf16>
    %cst = arith.constant dense<0.000000e+00> : vector<16x128xf32>
    %5 = tpu.matmul %3, %4, %cst {dimension_numbers = #tpu.dot_dimension_numbers<[1], [0], [0], [1], [0, 0, 1, 1], [], []>} : vector<16x128xbf16>, vector<128x128xbf16>, vector<16x128xf32> -> vector<16x128xf32>
    %c0_7 = arith.constant 0 : index
    %c0_8 = arith.constant 0 : index
    %6 = vector.load %arg7[%c0_7, %c0_8] : memref<1x128xf32, #tpu.memory_space<vmem>>, vector<1x128xf32>
    %7 = vector.broadcast %6 : vector<1x128xf32> to vector<16x128xf32>
    %8 = arith.addf %5, %7 : vector<16x128xf32>
    %c0_9 = arith.constant 0 : index
    %c0_10 = arith.constant 0 : index
    %9 = vector.load %arg2[%c0_9, %c0_10] : memref<16x128xf32, #tpu.memory_space<vmem>>, vector<16x128xf32>
    %10 = tpu.concatenate %9, %8 in 0 : vector<16x128xf32>, vector<16x128xf32> -> vector<32x128xf32>
    %c0_11 = arith.constant 0 : index
    %c0_12 = arith.constant 0 : index
    %11 = vector.load %arg8[%c0_11, %c0_12] : memref<256x128xbf16, #tpu.memory_space<vmem>>, vector<256x128xbf16>
    %c0_13 = arith.constant 0 : index
    %c0_14 = arith.constant 0 : index
    %12 = vector.load %arg9[%c0_13, %c0_14] : memref<1x128xf32, #tpu.memory_space<vmem>>, vector<1x128xf32>
    %cst_15 = arith.constant 0.000000e+00 : f32
    %13 = vector.broadcast %cst_15 : f32 to vector<32x128xf32>
    %14 = arith.truncf %10 : vector<32x128xf32> to vector<32x128xbf16>
    %15 = vector.extract_strided_slice %14 {offsets = [16, 0], sizes = [16, 128], strides = [1, 1]} : vector<32x128xbf16> to vector<16x128xbf16>
    %cst_16 = arith.constant dense<0.000000e+00> : vector<16x128xf32>
    %16 = tpu.matmul %0, %15, %cst_16 {dimension_numbers = #tpu.dot_dimension_numbers<[1], [0], [0], [1], [0, 0, 1, 1], [], []>} : vector<16x16xbf16>, vector<16x128xbf16>, vector<16x128xf32> -> vector<16x128xf32>
    %17 = vector.extract_strided_slice %14 {offsets = [0, 0], sizes = [16, 128], strides = [1, 1]} : vector<32x128xbf16> to vector<16x128xbf16>
    %cst_17 = arith.constant dense<0.000000e+00> : vector<16x128xf32>
    %18 = tpu.matmul %1, %17, %cst_17 {dimension_numbers = #tpu.dot_dimension_numbers<[1], [0], [0], [1], [0, 0, 1, 1], [], []>} : vector<16x16xbf16>, vector<16x128xbf16>, vector<16x128xf32> -> vector<16x128xf32>
    %19 = tpu.concatenate %16, %18 in 0 : vector<16x128xf32>, vector<16x128xf32> -> vector<32x128xf32>
    %20 = arith.mulf %19, %10 : vector<32x128xf32>
    %21 = tpu.concatenate %19, %20 in 1 : vector<32x128xf32>, vector<32x128xf32> -> vector<32x256xf32>
    %22 = arith.truncf %21 : vector<32x256xf32> to vector<32x256xbf16>
    %cst_18 = arith.constant dense<0.000000e+00> : vector<32x128xf32>
    %23 = tpu.matmul %22, %11, %cst_18 {dimension_numbers = #tpu.dot_dimension_numbers<[1], [0], [0], [1], [0, 0, 1, 1], [], []>} : vector<32x256xbf16>, vector<256x128xbf16>, vector<32x128xf32> -> vector<32x128xf32>
    %24 = vector.broadcast %12 : vector<1x128xf32> to vector<32x128xf32>
    %25 = arith.addf %23, %24 : vector<32x128xf32>
    %26 = arith.addf %19, %20 : vector<32x128xf32>
    %27 = arith.addf %13, %25 : vector<32x128xf32>
    %28 = arith.truncf %26 : vector<32x128xf32> to vector<32x128xbf16>
    %29 = vector.extract_strided_slice %28 {offsets = [16, 0], sizes = [16, 128], strides = [1, 1]} : vector<32x128xbf16> to vector<16x128xbf16>
    %cst_19 = arith.constant dense<0.000000e+00> : vector<16x128xf32>
    %30 = tpu.matmul %0, %29, %cst_19 {dimension_numbers = #tpu.dot_dimension_numbers<[1], [0], [0], [1], [0, 0, 1, 1], [], []>} : vector<16x16xbf16>, vector<16x128xbf16>, vector<16x128xf32> -> vector<16x128xf32>
    %31 = vector.extract_strided_slice %28 {offsets = [0, 0], sizes = [16, 128], strides = [1, 1]} : vector<32x128xbf16> to vector<16x128xbf16>
    %cst_20 = arith.constant dense<0.000000e+00> : vector<16x128xf32>
    %32 = tpu.matmul %1, %31, %cst_20 {dimension_numbers = #tpu.dot_dimension_numbers<[1], [0], [0], [1], [0, 0, 1, 1], [], []>} : vector<16x16xbf16>, vector<16x128xbf16>, vector<16x128xf32> -> vector<16x128xf32>
    %33 = tpu.concatenate %30, %32 in 0 : vector<16x128xf32>, vector<16x128xf32> -> vector<32x128xf32>
    %34 = arith.mulf %33, %26 : vector<32x128xf32>
    %35 = tpu.concatenate %33, %34 in 1 : vector<32x128xf32>, vector<32x128xf32> -> vector<32x256xf32>
    %36 = arith.truncf %35 : vector<32x256xf32> to vector<32x256xbf16>
    %cst_21 = arith.constant dense<0.000000e+00> : vector<32x128xf32>
    %37 = tpu.matmul %36, %11, %cst_21 {dimension_numbers = #tpu.dot_dimension_numbers<[1], [0], [0], [1], [0, 0, 1, 1], [], []>} : vector<32x256xbf16>, vector<256x128xbf16>, vector<32x128xf32> -> vector<32x128xf32>
    %38 = vector.broadcast %12 : vector<1x128xf32> to vector<32x128xf32>
    %39 = arith.addf %37, %38 : vector<32x128xf32>
    %40 = arith.addf %27, %39 : vector<32x128xf32>
    %cst_22 = arith.constant 0.000000e+00 : f32
    %41 = vector.broadcast %cst_22 : f32 to vector<32x128xf32>
    %42 = arith.maximumf %40, %41 : vector<32x128xf32>
    %c0_23 = arith.constant 0 : index
    %c0_24 = arith.constant 0 : index
    %43 = vector.load %arg10[%c0_23, %c0_24] : memref<256x128xbf16, #tpu.memory_space<vmem>>, vector<256x128xbf16>
    %c0_25 = arith.constant 0 : index
    %c0_26 = arith.constant 0 : index
    %44 = vector.load %arg11[%c0_25, %c0_26] : memref<1x128xf32, #tpu.memory_space<vmem>>, vector<1x128xf32>
    %cst_27 = arith.constant 0.000000e+00 : f32
    %45 = vector.broadcast %cst_27 : f32 to vector<32x128xf32>
    %46 = arith.truncf %42 : vector<32x128xf32> to vector<32x128xbf16>
    %47 = vector.extract_strided_slice %46 {offsets = [16, 0], sizes = [16, 128], strides = [1, 1]} : vector<32x128xbf16> to vector<16x128xbf16>
    %cst_28 = arith.constant dense<0.000000e+00> : vector<16x128xf32>
    %48 = tpu.matmul %0, %47, %cst_28 {dimension_numbers = #tpu.dot_dimension_numbers<[1], [0], [0], [1], [0, 0, 1, 1], [], []>} : vector<16x16xbf16>, vector<16x128xbf16>, vector<16x128xf32> -> vector<16x128xf32>
    %49 = vector.extract_strided_slice %46 {offsets = [0, 0], sizes = [16, 128], strides = [1, 1]} : vector<32x128xbf16> to vector<16x128xbf16>
    %cst_29 = arith.constant dense<0.000000e+00> : vector<16x128xf32>
    %50 = tpu.matmul %1, %49, %cst_29 {dimension_numbers = #tpu.dot_dimension_numbers<[1], [0], [0], [1], [0, 0, 1, 1], [], []>} : vector<16x16xbf16>, vector<16x128xbf16>, vector<16x128xf32> -> vector<16x128xf32>
    %51 = tpu.concatenate %48, %50 in 0 : vector<16x128xf32>, vector<16x128xf32> -> vector<32x128xf32>
    %52 = arith.mulf %51, %42 : vector<32x128xf32>
    %53 = tpu.concatenate %51, %52 in 1 : vector<32x128xf32>, vector<32x128xf32> -> vector<32x256xf32>
    %54 = arith.truncf %53 : vector<32x256xf32> to vector<32x256xbf16>
    %cst_30 = arith.constant dense<0.000000e+00> : vector<32x128xf32>
    %55 = tpu.matmul %54, %43, %cst_30 {dimension_numbers = #tpu.dot_dimension_numbers<[1], [0], [0], [1], [0, 0, 1, 1], [], []>} : vector<32x256xbf16>, vector<256x128xbf16>, vector<32x128xf32> -> vector<32x128xf32>
    %56 = vector.broadcast %44 : vector<1x128xf32> to vector<32x128xf32>
    %57 = arith.addf %55, %56 : vector<32x128xf32>
    %58 = arith.addf %51, %52 : vector<32x128xf32>
    %59 = arith.addf %45, %57 : vector<32x128xf32>
    %60 = arith.truncf %58 : vector<32x128xf32> to vector<32x128xbf16>
    %61 = vector.extract_strided_slice %60 {offsets = [16, 0], sizes = [16, 128], strides = [1, 1]} : vector<32x128xbf16> to vector<16x128xbf16>
    %cst_31 = arith.constant dense<0.000000e+00> : vector<16x128xf32>
    %62 = tpu.matmul %0, %61, %cst_31 {dimension_numbers = #tpu.dot_dimension_numbers<[1], [0], [0], [1], [0, 0, 1, 1], [], []>} : vector<16x16xbf16>, vector<16x128xbf16>, vector<16x128xf32> -> vector<16x128xf32>
    %63 = vector.extract_strided_slice %60 {offsets = [0, 0], sizes = [16, 128], strides = [1, 1]} : vector<32x128xbf16> to vector<16x128xbf16>
    %cst_32 = arith.constant dense<0.000000e+00> : vector<16x128xf32>
    %64 = tpu.matmul %1, %63, %cst_32 {dimension_numbers = #tpu.dot_dimension_numbers<[1], [0], [0], [1], [0, 0, 1, 1], [], []>} : vector<16x16xbf16>, vector<16x128xbf16>, vector<16x128xf32> -> vector<16x128xf32>
    %65 = tpu.concatenate %62, %64 in 0 : vector<16x128xf32>, vector<16x128xf32> -> vector<32x128xf32>
    %66 = arith.mulf %65, %58 : vector<32x128xf32>
    %67 = tpu.concatenate %65, %66 in 1 : vector<32x128xf32>, vector<32x128xf32> -> vector<32x256xf32>
    %68 = arith.truncf %67 : vector<32x256xf32> to vector<32x256xbf16>
    %cst_33 = arith.constant dense<0.000000e+00> : vector<32x128xf32>
    %69 = tpu.matmul %68, %43, %cst_33 {dimension_numbers = #tpu.dot_dimension_numbers<[1], [0], [0], [1], [0, 0, 1, 1], [], []>} : vector<32x256xbf16>, vector<256x128xbf16>, vector<32x128xf32> -> vector<32x128xf32>
    %70 = vector.broadcast %44 : vector<1x128xf32> to vector<32x128xf32>
    %71 = arith.addf %69, %70 : vector<32x128xf32>
    %72 = arith.addf %59, %71 : vector<32x128xf32>
    %cst_34 = arith.constant 0.000000e+00 : f32
    %73 = vector.broadcast %cst_34 : f32 to vector<32x128xf32>
    %74 = arith.maximumf %72, %73 : vector<32x128xf32>
    %75 = arith.addf %74, %10 : vector<32x128xf32>
    %76 = vector.extract_strided_slice %75 {offsets = [0, 0], sizes = [16, 128], strides = [1, 1]} : vector<32x128xf32> to vector<16x128xf32>
    %c0_35 = arith.constant 0 : index
    %c0_36 = arith.constant 0 : index
    %77 = vector.load %arg12[%c0_35, %c0_36] : memref<16x128xf32, #tpu.memory_space<vmem>>, vector<16x128xf32>
    tpu.vector_store %arg12[%c0_35, %c0_36], %76 {strides = array<i32>} : memref<16x128xf32, #tpu.memory_space<vmem>>, vector<16x128xf32>,
    %78 = vector.extract_strided_slice %75 {offsets = [16, 0], sizes = [16, 128], strides = [1, 1]} : vector<32x128xf32> to vector<16x128xf32>
    %c0_37 = arith.constant 0 : index
    %c0_38 = arith.constant 0 : index
    %79 = vector.load %arg13[%c0_37, %c0_38] : memref<16x128xf32, #tpu.memory_space<vmem>>, vector<16x128xf32>
    tpu.vector_store %arg13[%c0_37, %c0_38], %78 {strides = array<i32>} : memref<16x128xf32, #tpu.memory_space<vmem>>, vector<16x128xf32>,
    %cst_39 = arith.constant 0.000000e+00 : f32
    %c0_i32 = arith.constant 0 : i32
    %c8_i32 = arith.constant 8 : i32
    %80 = arith.addi %c0_i32, %c8_i32 : i32
    %c1_i32 = arith.constant 1 : i32
    %81 = scf.for %arg15 = %c0_i32 to %80 step %c1_i32 iter_args(%arg16 = %cst_39) -> (f32)  : i32 {
      %c0_51 = arith.constant 0 : index
      %90 = arith.index_cast %arg15 : i32 to index
      %91 = memref.load %arg0[%c0_51, %90] : memref<2x8xi32, #tpu.memory_space<smem>>
      %c1 = arith.constant 1 : index
      %92 = arith.index_cast %arg15 : i32 to index
      %93 = memref.load %arg0[%c1, %92] : memref<2x8xi32, #tpu.memory_space<smem>>
      %94 = arith.index_cast %91 : i32 to index
      %c0_52 = arith.constant 0 : index
      %95 = vector.load %arg12[%94, %c0_52] : memref<16x128xf32, #tpu.memory_space<vmem>>, vector<1x128xf32>
      %96 = arith.index_cast %93 : i32 to index
      %c0_53 = arith.constant 0 : index
      %97 = vector.load %arg13[%96, %c0_53] : memref<16x128xf32, #tpu.memory_space<vmem>>, vector<1x128xf32>
      %98 = arith.mulf %95, %97 : vector<1x128xf32>
      %99 = vector.shape_cast %98 : vector<1x128xf32> to vector<1x1x128xf32>
      %cst_54 = arith.constant dense<0.000000e+00> : vector<1xf32>
      %100 = vector.multi_reduction <add>, %99, %cst_54 [1, 2] : vector<1x1x128xf32> to vector<1xf32>
      %101 = vector.shape_cast %100 : vector<1xf32> to vector<1x1x1xf32>
      %102 = vector.extract %101[0, 0, 0] : f32 from vector<1x1x1xf32>
      %103 = math.absf %102 : f32
      %cst_55 = arith.constant 0.000000e+00 : f32
      %104 = arith.subf %cst_55, %103 : f32
      %105 = math.exp %104 : f32
      %cst_56 = arith.constant 0.000000e+00 : f32
      %106 = arith.cmpf oge, %102, %cst_56 : f32
      %cst_57 = arith.constant 1.000000e+00 : f32
      %107 = arith.addf %cst_57, %105 : f32
      %cst_58 = arith.constant 1.000000e+00 : f32
      %108 = arith.divf %cst_58, %107 : f32
      %cst_59 = arith.constant 1.000000e+00 : f32
      %109 = arith.addf %cst_59, %105 : f32
      %110 = arith.divf %105, %109 : f32
      %111 = arith.select %106, %108, %110 : f32
      %cst_60 = arith.constant 1.000000e-15 : f32
      %112 = arith.addf %111, %cst_60 : f32
      %113 = math.log %112 : f32
      %114 = arith.subf %arg16, %113 : f32
      scf.yield %114 : f32
    }
    %c8_i32_40 = arith.constant 8 : i32
    %cst_41 = arith.constant 8.000000e+00 : f32
    %82 = arith.divf %81, %cst_41 : f32
    %cst_42 = arith.constant 0.000000e+00 : f32
    %c0_i32_43 = arith.constant 0 : i32
    %c8_i32_44 = arith.constant 8 : i32
    %83 = arith.addi %c0_i32_43, %c8_i32_44 : i32
    %c1_i32_45 = arith.constant 1 : i32
    %84 = scf.for %arg15 = %c0_i32_43 to %83 step %c1_i32_45 iter_args(%arg16 = %cst_42) -> (f32)  : i32 {
      %c0_51 = arith.constant 0 : index
      %90 = arith.index_cast %arg15 : i32 to index
      %91 = memref.load %arg1[%c0_51, %90] : memref<2x8xi32, #tpu.memory_space<smem>>
      %c1 = arith.constant 1 : index
      %92 = arith.index_cast %arg15 : i32 to index
      %93 = memref.load %arg1[%c1, %92] : memref<2x8xi32, #tpu.memory_space<smem>>
      %94 = arith.index_cast %91 : i32 to index
      %c0_52 = arith.constant 0 : index
      %95 = vector.load %arg12[%94, %c0_52] : memref<16x128xf32, #tpu.memory_space<vmem>>, vector<1x128xf32>
      %96 = arith.index_cast %93 : i32 to index
      %c0_53 = arith.constant 0 : index
      %97 = vector.load %arg13[%96, %c0_53] : memref<16x128xf32, #tpu.memory_space<vmem>>, vector<1x128xf32>
      %98 = arith.mulf %95, %97 : vector<1x128xf32>
      %99 = vector.shape_cast %98 : vector<1x128xf32> to vector<1x1x128xf32>
      %cst_54 = arith.constant dense<0.000000e+00> : vector<1xf32>
      %100 = vector.multi_reduction <add>, %99, %cst_54 [1, 2] : vector<1x1x128xf32> to vector<1xf32>
      %101 = vector.shape_cast %100 : vector<1xf32> to vector<1x1x1xf32>
      %102 = vector.extract %101[0, 0, 0] : f32 from vector<1x1x1xf32>
      %103 = math.absf %102 : f32
      %cst_55 = arith.constant 0.000000e+00 : f32
      %104 = arith.subf %cst_55, %103 : f32
      %105 = math.exp %104 : f32
      %cst_56 = arith.constant 0.000000e+00 : f32
      %106 = arith.cmpf oge, %102, %cst_56 : f32
      %cst_57 = arith.constant 1.000000e+00 : f32
      %107 = arith.addf %cst_57, %105 : f32
      %cst_58 = arith.constant 1.000000e+00 : f32
      %108 = arith.divf %cst_58, %107 : f32
      %cst_59 = arith.constant 1.000000e+00 : f32
      %109 = arith.addf %cst_59, %105 : f32
      %110 = arith.divf %105, %109 : f32
      %111 = arith.select %106, %108, %110 : f32
      %cst_60 = arith.constant 1.000000e+00 : f32
      %112 = arith.subf %cst_60, %111 : f32
      %cst_61 = arith.constant 1.000000e-15 : f32
      %113 = arith.addf %112, %cst_61 : f32
      %114 = math.log %113 : f32
      %115 = arith.subf %arg16, %114 : f32
      scf.yield %115 : f32
    }
    %c8_i32_46 = arith.constant 8 : i32
    %cst_47 = arith.constant 8.000000e+00 : f32
    %85 = arith.divf %84, %cst_47 : f32
    %86 = arith.addf %82, %85 : f32
    %cst_48 = arith.constant 5.000000e-01 : f32
    %87 = arith.mulf %cst_48, %86 : f32
    %88 = vector.broadcast %87 : f32 to vector<1x1xf32>
    %c0_49 = arith.constant 0 : index
    %c0_50 = arith.constant 0 : index
    %89 = vector.load %arg14[%c0_49, %c0_50] : memref<1x1xf32, #tpu.memory_space<vmem>>, vector<1x1xf32>
    tpu.vector_store %arg14[%c0_49, %c0_50], %88 {strides = array<i32>} : memref<1x1xf32, #tpu.memory_space<vmem>>, vector<1x1xf32>,
    return
  }
}

</mosaic_0001>

<bundles_post_ra>
// kernel: tpu_custom_call.1
= control target key start
LH: loop header
LB: loop body
LE: loop exit
PB: predicated region body
PF: predicated region fallthrough
CT: control target
= control target key end

     0   :  { %s2356_s0 = inlined_call_operand.hbm [shape: s32[2,8], index: 0, kind: input, shape index: {}]   ;;  %s2357_s1 = inlined_call_operand.vmem [shape: s32[2,8], index: 1, kind: input, shape index: {}]   ;;  %s2358_s2 = inlined_call_operand.hbm [shape: f32[16,128], index: 2, kind: input, shape index: {}]   ;;  %s2359_s3 = inlined_call_operand.hbm [shape: f32[16,128], index: 3, kind: input, shape index: {}]   ;;  %s2360_s4 = inlined_call_operand.vmem [shape: bf16[16,16], index: 4, kind: input, shape index: {}]   ;;  %s2361_s5 = inlined_call_operand.vmem [shape: bf16[16,16], index: 5, kind: input, shape index: {}]   ;;  %s2362_s6 = inlined_call_operand.hbm [shape: bf16[128,128], index: 6, kind: input, shape index: {}]   ;;  %s2363_s7 = inlined_call_operand.vmem [shape: f32[1,128], index: 7, kind: input, shape index: {}]   ;;  %s2364_s8 = inlined_call_operand.hbm [shape: bf16[256,128], index: 8, kind: input, shape index: {}]   ;;  %s2365_s9 = inlined_call_operand.vmem [shape: f32[1,128], index: 9, kind: input, shape index: {}]   ;;  %s2366_s10 = inlined_call_operand.hbm [shape: bf16[256,128], index: 10, kind: input, shape index: {}]   ;;  %s2367_s11 = inlined_call_operand.vmem [shape: f32[1,128], index: 11, kind: input, shape index: {}]   ;;  %s2368_s12 = inlined_call_operand.hbm [shape: f32[16,128], index: 12, kind: output, shape index: {0}]   ;;  %s2369_s13 = inlined_call_operand.hbm [shape: f32[16,128], index: 13, kind: output, shape index: {1}]   ;;  %s2370_s14 = inlined_call_operand.hbm [shape: f32[1,1], index: 14, kind: output, shape index: {2}]  }
   0x1   :  { %2372 = sst [smem:[#allocation26_spill]] %s2370_s14 }
   0x2   :  { %20 = vsyncpa [#allocation5], 0 }
   0x3   :  { %21 = vsyncpa [#allocation6], 0 }
   0x4   :  { %22 = vsyncpa [#allocation3], 0 }
   0x5   :  { %23 = vsyncpa [#allocation10], 0 }
   0x6   :  { %24 = vsyncpa [#allocation13], 0 }
   0x7   :  { %25 = vsyncpa [#allocation4], 0 }
   0x8   :  { %26 = vsyncpa [#allocation17], 0  ;;  %s1966_s29 = smov [#allocation9]   ;;  %s1722_s17 = scalar_lea.hbm %s2359_s3, 256 }
   0x9   :  { %s62_s30 = sshll.u32 %s1966_s29, 4  ;;  %p1723_p0 = scmp.ne.s32.totalorder %s2359_s3, %s1722_s17  ;;  %s63_s30 = int_to_ptr.vmem [resolvable:$true] %s62_s30 }
   0xa   :  { %p1726_p1 = scmp.lt.u32.totalorder %s1722_s17, %s2359_s3 }
   0xc   :  { %p1728_p2 = pnand %p1726_p1, %p1723_p0 }
   0xe   :  { %1731 = shalt.err (!%p1728_p2)
}
   0xf   :  { %s1732_s22 = scalar_lea.vmem %s63_s30, 256  ;;  %p1737_p4 = scmp.lt.s32.totalorder %s63_s30, %s63_s30 }
  0x10   :  { %p1733_p3 = scmp.ne.s32.totalorder %s63_s30, %s1732_s22  ;;  %p1738_p5 = scmp.lt.s32.totalorder %s1732_s22, %s1732_s22 }
  0x12   :  { %p1739_p6 = por %p1738_p5, %p1737_p4 }
  0x14   :  { %p1740_p7 = pnand %p1739_p6, %p1733_p3 }
  0x16   :  { %1743 = shalt.err (!%p1740_p7)
}
  0x17   :  { %s1967_s23 = smov 128   ;;  %s1968_s24 = smov 8  }
  0x18   :  { %68 = dma.hbm_to_vmem [thread:$0]  %s2359_s3, 256, %s63_s30, [#allocation10], %s1967_s23, %s1967_s23, %s1968_s24  }
  0x19   :  { %s1969_s27 = smov [#allocation12]   ;;  %s41_s16 = sshll.u32 %s2357_s1, 4  ;;  %s42_s16 = int_to_ptr.vmem [resolvable:$true] %s41_s16 }
  0x1a   :  { %s92_s28 = sshll.u32 %s1969_s27, 4  ;;  %s1744_s19 = scalar_lea.hbm %s2364_s8, 2048  ;;  %s93_s28 = int_to_ptr.vmem [resolvable:$true] %s92_s28 }
  0x1b   :  { %p1745_p8 = scmp.ne.s32.totalorder %s2364_s8, %s1744_s19  ;;  %p1748_p9 = scmp.lt.u32.totalorder %s1744_s19, %s2364_s8 }
  0x1d   :  { %p1750_p10 = pnand %p1748_p9, %p1745_p8 }
  0x1f   :  { %1753 = shalt.err (!%p1750_p10)
}
  0x20   :  { %s1754_s3 = scalar_lea.vmem %s93_s28, 2048  ;;  %p1759_p12 = scmp.lt.s32.totalorder %s93_s28, %s93_s28 }
  0x21   :  { %p1755_p11 = scmp.ne.s32.totalorder %s93_s28, %s1754_s3  ;;  %p1760_p13 = scmp.lt.s32.totalorder %s1754_s3, %s1754_s3 }
  0x23   :  { %p1761_p0 = por %p1760_p13, %p1759_p12 }
  0x25   :  { %p1762_p1 = pnand %p1761_p0, %p1755_p11 }
  0x27   :  { %1765 = shalt.err (!%p1762_p1)
}
  0x28   :  { %s1970_s1 = smov 64   ;;  %s1971_s30 = smov 4  }
  0x29   :  { %98 = dma.hbm_to_vmem [thread:$0]  %s2364_s8, 2048, %s93_s28, [#allocation13], %s1970_s1, %s1970_s1, %s1971_s30  }
  0x2a   :  { %s1766_s29 = scalar_lea.hbm %s2356_s0, 32 }
  0x2b   :  { %p1767_p2 = scmp.ne.s32.totalorder %s2356_s0, %s1766_s29  ;;  %p1770_p3 = scmp.lt.u32.totalorder %s1766_s29, %s2356_s0 }
  0x2d   :  { %p1772_p4 = pnand %p1770_p3, %p1767_p2 }
  0x2f   :  { %1775 = shalt.err (!%p1772_p4)
}
  0x30   :  { %s1972_s20 = smov [#allocation2]   ;;  %s1776_s8 = scalar_lea.vmem %s42_s16, 32 }
  0x31   :  { %34 = dma.hbm_to_smem %s2356_s0, 32, %s1972_s20, [#allocation5]  }
  0x32   :  { %p1777_p5 = scmp.ne.s32.totalorder %s42_s16, %s1776_s8  ;;  %p1781_p6 = scmp.lt.s32.totalorder %s42_s16, %s42_s16 }
  0x33   :  { %p1782_p7 = scmp.lt.s32.totalorder %s1776_s8, %s1776_s8 }
  0x35   :  { %p1783_p8 = por %p1782_p7, %p1781_p6 }
  0x37   :  { %p1784_p9 = pnand %p1783_p8, %p1777_p5 }
  0x39   :  { %1787 = shalt.err (!%p1784_p9)
}
  0x3a   :  { %s1973_s28 = smov [#allocation7]   ;;  %s1974_s3 = smov [#allocation8]  }
  0x3b   :  { %44 = dma.vmem_to_smem %s42_s16, 32, %s1973_s28, [#allocation6]  }
  0x3c   :  { %s50_s25 = sshll.u32 %s1974_s3, 4  ;;  %s1975_s26 = smov [#allocation11]   ;;  %s51_s25 = int_to_ptr.vmem [resolvable:$true] %s50_s25 }
  0x3d   :  { %s78_s14 = sshll.u32 %s1975_s26, 4  ;;  %s1788_s0 = scalar_lea.hbm %s2358_s2, 256  ;;  %s2102_s14 = int_to_ptr.vmem [resolvable:$true] %s78_s14 }
  0x3e   :  { %p1789_p10 = scmp.ne.s32.totalorder %s2358_s2, %s1788_s0  ;;  %p1792_p11 = scmp.lt.u32.totalorder %s1788_s0, %s2358_s2 }
  0x40   :  { %p1794_p12 = pnand %p1792_p11, %p1789_p10 }
  0x42   :  { %1797 = shalt.err (!%p1794_p12)
}
  0x43   :  { %s1798_s16 = scalar_lea.vmem %s51_s25, 256  ;;  %p1803_p0 = scmp.lt.s32.totalorder %s51_s25, %s51_s25 }
  0x44   :  { %p1799_p13 = scmp.ne.s32.totalorder %s51_s25, %s1798_s16  ;;  %p1804_p1 = scmp.lt.s32.totalorder %s1798_s16, %s1798_s16 }
  0x46   :  { %p1805_p2 = por %p1804_p1, %p1803_p0 }
  0x48   :  { %p1806_p3 = pnand %p1805_p2, %p1799_p13 }
  0x4a   :  { %1809 = shalt.err (!%p1806_p3)
}
  0x4b   :  { %56 = dma.hbm_to_vmem [thread:$0]  %s2358_s2, 256, %s51_s25, [#allocation3], %s1967_s23, %s1967_s23, %s1968_s24  }
  0x4c   :  { %s1810_s28 = scalar_lea.hbm %s2362_s6, 1024 }
  0x4d   :  { %p1811_p4 = scmp.ne.s32.totalorder %s2362_s6, %s1810_s28  ;;  %p1814_p5 = scmp.lt.u32.totalorder %s1810_s28, %s2362_s6 }
  0x4f   :  { %p1816_p6 = pnand %p1814_p5, %p1811_p4 }
  0x51   :  { %1819 = shalt.err (!%p1816_p6)
}
  0x52   :  { %s1820_s0 = scalar_lea.vmem %s2102_s14, 1024  ;;  %p1825_p8 = scmp.lt.s32.totalorder %s2102_s14, %s2102_s14 }
  0x53   :  { %p1821_p7 = scmp.ne.s32.totalorder %s2102_s14, %s1820_s0  ;;  %p1826_p9 = scmp.lt.s32.totalorder %s1820_s0, %s1820_s0 }
  0x55   :  { %p1827_p10 = por %p1826_p9, %p1825_p8 }
  0x57   :  { %p1828_p11 = pnand %p1827_p10, %p1821_p7 }
  0x59   :  { %1831 = shalt.err (!%p1828_p11)
}
  0x5a   :  { %84 = dma.hbm_to_vmem [thread:$0]  %s2362_s6, 1024, %s2102_s14, [#allocation10], %s1970_s1, %s1970_s1, %s1971_s30  }
  0x5b   :  { %s1976_s15 = smov [#allocation14]   ;;  %s1832_s16 = scalar_lea.hbm %s2366_s10, 2048 }
  0x5c   :  { %s106_s17 = sshll.u32 %s1976_s15, 4  ;;  %p1833_p12 = scmp.ne.s32.totalorder %s2366_s10, %s1832_s16  ;;  %s107_s17 = int_to_ptr.vmem [resolvable:$true] %s106_s17 }
  0x5d   :  { %p1836_p13 = scmp.lt.u32.totalorder %s1832_s16, %s2366_s10 }
  0x5f   :  { %p1838_p0 = pnand %p1836_p13, %p1833_p12 }
  0x61   :  { %1841 = shalt.err (!%p1838_p0)
}
  0x62   :  { %s1842_s28 = scalar_lea.vmem %s107_s17, 2048  ;;  %p1847_p2 = scmp.lt.s32.totalorder %s107_s17, %s107_s17 }
  0x63   :  { %p1843_p1 = scmp.ne.s32.totalorder %s107_s17, %s1842_s28  ;;  %p1848_p3 = scmp.lt.s32.totalorder %s1842_s28, %s1842_s28 }
  0x65   :  { %p1849_p4 = por %p1848_p3, %p1847_p2 }
  0x67   :  { %p1850_p5 = pnand %p1849_p4, %p1843_p1 }
  0x69   :  { %1853 = shalt.err (!%p1850_p5)
}
  0x6a   :  { %112 = dma.hbm_to_vmem [thread:$0]  %s2366_s10, 2048, %s107_s17, [#allocation13], %s1970_s1, %s1970_s1, %s1971_s30  }
  0x6b   :  { %1936 = dma.done.wait [#allocation5], 32  }
  0x6c   :  { %1937 = vsyncadd [#allocation5], 4294967264 }
  0x6d   :  { %1938 = dma.done.wait [#allocation6], 32  }
  0x6e   :  { %1939 = vsyncadd [#allocation6], 4294967264 }
  0x6f   :  { %1940 = dma.done.wait [#allocation3], 256  }
  0x70   :  { %1941 = vsyncadd [#allocation3], 4294967040 }
  0x71   :  { %1942 = dma.done.wait [#allocation10], 1280  }
  0x72   :  { %1943 = vsyncadd [#allocation10], 4294966016 }
  0x73   :  { %1944 = dma.done.wait [#allocation13], 4096  }
  0x74   :  { %1945 = vsyncadd [#allocation13], 4294963200 }
  0x75   :  { %136 = sfence }
  0x76   :  { %v1668_v0 = vld [vmem:[#allocation11] sm:$0xff]   ;;  %v1977_v1 = vmov 0.0   ;;  %v1669_v2 = vld [vmem:[#allocation11 + $0x8] sm:$0xff]   ;;  %vm1978_vm0 = vmmov 0   ;;  %v1670_v3 = vld [vmem:[#allocation11 + $0x10] sm:$0xff]   ;;  %vm299_vm1 = vcmask 130048  }
  0x77   :  { %1536 = vmatprep.subr.bf16.mxu0 %v1977_v1  ;;  %1556 = vmatprep.subr.bf16.mxu1 %v1977_v1  ;;  %v1671_v4 = vld [vmem:[#allocation11 + $0x18] sm:$0xff]   ;;  %v1672_v5 = vld [vmem:[#allocation11 + $0x20] sm:$0xff]   ;;  %v1673_v6 = vld [vmem:[#allocation11 + $0x28] sm:$0xff]   ;;  %s2270_s29 = smov 0  }
  0x78   :  { %1537 = vmatpush3.bf16.msra.mxu0 %v1668_v0  ;;  %1552 = vmatprep.mubr.msk.bf16.mxu0 %vm1978_vm0, %v1977_v1  ;;  %v1674_v7 = vld [vmem:[#allocation11 + $0x30] sm:$0xff]   ;;  %v1675_v8 = vld [vmem:[#allocation11 + $0x38] sm:$0xff]   ;;  %v2177_v19 = vld [vmem:[#allocation8] sm:$0xff] }
  0x79   :  { %1538 = vmatprep.subr.bf16.mxu0 %v1977_v1  ;;  %1558 = vmatprep.mubr.msk.bf16.mxu1 %vm1978_vm0, %v1977_v1  ;;  %v142_v9 = vld [vmem:[#allocation9] sm:$0xff]  ;;  %v143_v10 = vld [vmem:[#allocation9 + $0x8] sm:$0xff]  ;;  %v2179_v20 = vld [vmem:[#allocation8 + $0x8] sm:$0xff] }
  0x7a   :  { %v144_v11 = vpack.c.bf16 %v143_v10, %v142_v9  ;;  %v1340_v12 = vld [vmem:[%s2363_s7] ss:$0 sm:$0xff]  ;;  %v292_v23 = vpack.c.bf16 %v2179_v20, %v2177_v19  ;;  %v2191_v24 = vld [vmem:[#allocation12 + $0x40] sm:$0xff]   ;;  %v2205_v27 = vld [vmem:[#allocation12 + $0x48] sm:$0xff]  }
  0x7b   :  { %v2186_v22 = vld [vmem:[%s2360_s4] sm:$0xff]   ;;  %v2203_v26 = vld [vmem:[#allocation12] sm:$0xff]   ;;  %v2210_v28 = vld [vmem:[#allocation12 + $0x8] sm:$0xff]  }
  0x7c   :  { %1539 = vmatpush3.bf16.msra.mxu0 %v1669_v2  ;;  %v2201_v25 = vld [vmem:[%s2361_s5] sm:$0xff]   ;;  %v1684_v31 = vld [vmem:[#allocation12 + $0x58] sm:$0xff]   ;;  %v1686_v33 = vld [vmem:[#allocation12 + $0x60] sm:$0xff]  }
  0x7d   :  { %1540 = vmatprep.subr.bf16.mxu0 %v1977_v1  ;;  %v1682_v29 = vld [vmem:[#allocation12 + $0x50] sm:$0xff]   ;;  %v1685_v32 = vld [vmem:[#allocation12 + $0x18] sm:$0xff]   ;;  %v1687_v34 = vld [vmem:[#allocation12 + $0x20] sm:$0xff]  }
  0x7e   :  { %v1683_v30 = vld [vmem:[#allocation12 + $0x10] sm:$0xff]   ;;  %v1688_v35 = vld [vmem:[#allocation12 + $0x68] sm:$0xff]   ;;  %v1692_v39 = vld [vmem:[#allocation12 + $0x78] sm:$0xff]  }
  0x7f   :  { %v1689_v36 = vld [vmem:[#allocation12 + $0x28] sm:$0xff]   ;;  %v1690_v37 = vld [vmem:[#allocation12 + $0x70] sm:$0xff]   ;;  %v1693_v40 = vld [vmem:[#allocation12 + $0x38] sm:$0xff]  }
  0x80   :  { %1541 = vmatpush3.bf16.msra.mxu0 %v1670_v3  ;;  %v1691_v38 = vld [vmem:[#allocation12 + $0x30] sm:$0xff]  }
  0x81   :  { %1542 = vmatprep.subr.bf16.mxu0 %v1977_v1 }
  0x84   :  { %1543 = vmatpush3.bf16.msra.mxu0 %v1671_v4 }
  0x85   :  { %1544 = vmatprep.subr.bf16.mxu0 %v1977_v1 }
  0x88   :  { %1545 = vmatpush3.bf16.msra.mxu0 %v1672_v5 }
  0x89   :  { %1546 = vmatprep.subr.bf16.mxu0 %v1977_v1 }
  0x8c   :  { %1547 = vmatpush3.bf16.msra.mxu0 %v1673_v6 }
  0x8d   :  { %1548 = vmatprep.subr.bf16.mxu0 %v1977_v1 }
  0x90   :  { %1549 = vmatpush3.bf16.msra.mxu0 %v1674_v7 }
  0x91   :  { %1550 = vmatprep.subr.bf16.mxu0 %v1977_v1 }
  0x94   :  { %1551 = vmatpush3.bf16.msra.mxu0 %v1675_v8 }
  0x95   :  { %1580 = vmatprep.subr.bf16.mxu0 %v1977_v1 }
  0x97   :  { %1553 = vmatmul.mubr.bf16.vlgmr.msra.gmra.mrb[0].mxu0 %v144_v11 }
  0x98   :  { %1582 = vmatprep.mubr.msk.bf16.mxu0 %vm1978_vm0, %v1977_v1 }
 0x16a   :  { %v250_v13 = vpop.f32.mrb[0].mxu0 }
 0x16b   :  { %v1554_v14 = vpop.f32.mrb[1].mxu0  ;;  %v2173_v16 = vadd.f32 %v1340_v12, %v250_v13 }
 0x16c   :  { %v253_v15 = vpop.f32.mrb[2].mxu0 }
 0x16d   :  { %v2175_v17 = vadd.f32 %v1340_v12, %v253_v15  ;;  %v1555_v18 = vpop.f32.mrb[3].mxu0 }
 0x16f   :  { %v293_v21 = vpack.c.bf16 %v2175_v17, %v2173_v16 }
 0x171   :  { %1557 = vmatpush3.bf16.msra.mxu1 %v293_v21 }
 0x172   :  { %1562 = vmatprep.subr.bf16.mxu1 %v1977_v1 }
 0x174   :  { %1559 = vmatmul.mubr.msk.bf16.vlgmr.msra.gmra.mrb[0].mxu1 %vm299_vm1, %v2186_v22 }
 0x175   :  { %1563 = vmatpush3.bf16.msra.mxu1 %v292_v23  ;;  %1564 = vmatprep.mubr.msk.bf16.mxu1 %vm1978_vm0, %v1977_v1 }
 0x176   :  { %1412 = vmatprep.subr.bf16.mxu1 %v2191_v24 }
 0x17c   :  { %1565 = vmatmul.mubr.msk.bf16.vlgmr.msra.gmra.mrb[4].mxu1 %vm299_vm1, %v2201_v25 }
 0x17d   :  { %1413 = vmatpush3.bf16.msra.mxu1 %v2203_v26 }
 0x17e   :  { %1414 = vmatprep.subr.bf16.mxu1 %v2205_v27 }
 0x181   :  { %1415 = vmatpush3.bf16.msra.mxu1 %v2210_v28 }
 0x182   :  { %1416 = vmatprep.subr.bf16.mxu1 %v1682_v29 }
 0x185   :  { %1417 = vmatpush3.bf16.msra.mxu1 %v1683_v30 }
 0x186   :  { %1418 = vmatprep.subr.bf16.mxu1 %v1684_v31 }
 0x189   :  { %1419 = vmatpush3.bf16.msra.mxu1 %v1685_v32 }
 0x18a   :  { %1420 = vmatprep.subr.bf16.mxu1 %v1686_v33 }
 0x18d   :  { %1421 = vmatpush3.bf16.msra.mxu1 %v1687_v34 }
 0x18e   :  { %1422 = vmatprep.subr.bf16.mxu1 %v1688_v35 }
 0x191   :  { %1423 = vmatpush3.bf16.msra.mxu1 %v1689_v36 }
 0x192   :  { %1424 = vmatprep.subr.bf16.mxu1 %v1690_v37 }
 0x195   :  { %1425 = vmatpush3.bf16.msra.mxu1 %v1691_v38 }
 0x196   :  { %1426 = vmatprep.subr.bf16.mxu1 %v1692_v39 }
 0x199   :  { %1427 = vmatpush3.bf16.msra.mxu1 %v1693_v40 }
 0x19a   :  { %1568 = vmatprep.subr.bf16.mxu1 %v1977_v1 }
 0x247   :  { %v337_v41 = vpop.f32.mrb[0].mxu1 }
 0x248   :  { %v1560_v42 = vpop.f32.mrb[1].mxu1  ;;  %v393_v44 = vmul.f32 %v337_v41, %v2177_v19 }
 0x249   :  { %v340_v43 = vpop.f32.mrb[2].mxu1 }
 0x24a   :  { %v394_v45 = vmul.f32 %v340_v43, %v2179_v20  ;;  %v397_v46 = vpack.c.bf16 %v340_v43, %v337_v41  ;;  %v1561_v47 = vpop.f32.mrb[3].mxu1  ;;  %v552_v61 = vadd.f32 %v393_v44, %v337_v41 }
 0x24c   :  { %v398_v48 = vpack.c.bf16 %v394_v45, %v393_v44  ;;  %v553_v60 = vadd.f32 %v394_v45, %v340_v43 }
 0x24e   :  { %535 = vmatprep.mubr.bf16.mxu1 %v398_v48  ;;  %v560_v62 = vpack.c.bf16 %v553_v60, %v552_v61 }
 0x24f   :  { %v386_v49 = vpop.f32.mrb[4].mxu1  ;;  %536 = vmatmul.mubr.bf16.vlgmr.msra.gmra.mrb[8].mxu1 %v397_v46 }
 0x250   :  { %v395_v50 = vmul.f32 %v386_v49, %v2173_v16  ;;  %v1566_v51 = vpop.f32.mrb[5].mxu1 }
 0x251   :  { %v389_v52 = vpop.f32.mrb[6].mxu1 }
 0x252   :  { %v396_v53 = vmul.f32 %v389_v52, %v2175_v17  ;;  %v399_v54 = vpack.c.bf16 %v389_v52, %v386_v49  ;;  %v1567_v55 = vpop.f32.mrb[7].mxu1  ;;  %v554_v56 = vadd.f32 %v395_v50, %v386_v49 }
 0x254   :  { %v555_v57 = vadd.f32 %v396_v53, %v389_v52  ;;  %v400_v58 = vpack.c.bf16 %v396_v53, %v395_v50 }
 0x256   :  { %v561_v59 = vpack.c.bf16 %v555_v57, %v554_v56  ;;  %543 = vmatprep.mubr.bf16.mxu1 %v400_v58 }
 0x257   :  { %544 = vmatmul.mubr.bf16.gmra.mrb[12].mxu1 %v399_v54 }
 0x258   :  { %1569 = vmatpush3.bf16.msra.mxu1 %v561_v59  ;;  %1570 = vmatprep.mubr.msk.bf16.mxu1 %vm1978_vm0, %v1977_v1 }
 0x259   :  { %1574 = vmatprep.subr.bf16.mxu1 %v1977_v1 }
 0x25f   :  { %1571 = vmatmul.mubr.msk.bf16.vlgmr.msra.gmra.mrb[16].mxu1 %vm299_vm1, %v2186_v22 }
 0x260   :  { %1575 = vmatpush3.bf16.msra.mxu1 %v560_v62  ;;  %1576 = vmatprep.mubr.msk.bf16.mxu1 %vm1978_vm0, %v1977_v1 }
 0x261   :  { %1444 = vmatprep.subr.bf16.mxu1 %v2191_v24 }
 0x267   :  { %1577 = vmatmul.mubr.msk.bf16.vlgmr.msra.gmra.mrb[20].mxu1 %vm299_vm1, %v2201_v25 }
 0x268   :  { %1445 = vmatpush3.bf16.msra.mxu1 %v2203_v26 }
 0x269   :  { %1446 = vmatprep.subr.bf16.mxu1 %v2205_v27 }
 0x26c   :  { %1447 = vmatpush3.bf16.msra.mxu1 %v2210_v28 }
 0x26d   :  { %1448 = vmatprep.subr.bf16.mxu1 %v1682_v29 }
 0x270   :  { %1449 = vmatpush3.bf16.msra.mxu1 %v1683_v30 }
 0x271   :  { %1450 = vmatprep.subr.bf16.mxu1 %v1684_v31 }
 0x274   :  { %1451 = vmatpush3.bf16.msra.mxu1 %v1685_v32 }
 0x275   :  { %1452 = vmatprep.subr.bf16.mxu1 %v1686_v33 }
 0x278   :  { %1453 = vmatpush3.bf16.msra.mxu1 %v1687_v34 }
 0x279   :  { %1454 = vmatprep.subr.bf16.mxu1 %v1688_v35  ;;  %v1353_v35 = vld [vmem:[%s2365_s9] ss:$0 sm:$0xff] }
 0x27c   :  { %1455 = vmatpush3.bf16.msra.mxu1 %v1689_v36 }
 0x27d   :  { %1456 = vmatprep.subr.bf16.mxu1 %v1690_v37 }
 0x280   :  { %1457 = vmatpush3.bf16.msra.mxu1 %v1691_v38 }
 0x281   :  { %1458 = vmatprep.subr.bf16.mxu1 %v1692_v39 }
 0x284   :  { %1459 = vmatpush3.bf16.msra.mxu1 %v1693_v40 }
 0x285   :  { %1592 = vmatprep.subr.bf16.mxu1 %v1977_v1 }
 0x322   :  { %v1428_v63 = vpop.f32.mrb[8].mxu1 }
 0x323   :  { %v1429_v0 = vpop.f32.mrb[9].mxu1 }
 0x324   :  { %v1430_v2 = vadd.f32 %v1429_v0, %v1428_v63  ;;  %v1431_v3 = vpop.f32.mrb[10].mxu1  ;;  %v1694_v0 = vld [vmem:[#allocation14 + $0x40] sm:$0xff]  }
 0x325   :  { %v1432_v4 = vpop.f32.mrb[11].mxu1 }
 0x326   :  { %v1433_v5 = vadd.f32 %v1432_v4, %v1431_v3  ;;  %v538_v40 = vadd.f32 %v1430_v2, %v1353_v35  ;;  %v1695_v3 = vld [vmem:[#allocation14] sm:$0xff]   ;;  %v1696_v4 = vld [vmem:[#allocation14 + $0x48] sm:$0xff]  }
 0x328   :  { %v541_v43 = vadd.f32 %v1433_v5, %v1353_v35  ;;  %v1697_v5 = vld [vmem:[#allocation14 + $0x8] sm:$0xff]  }
 0x32a   :  { %v1434_v6 = vpop.f32.mrb[12].mxu1 }
 0x32b   :  { %v1435_v7 = vpop.f32.mrb[13].mxu1 }
 0x32c   :  { %v1436_v8 = vadd.f32 %v1435_v7, %v1434_v6  ;;  %v1437_v9 = vpop.f32.mrb[14].mxu1  ;;  %v1698_v6 = vld [vmem:[#allocation14 + $0x50] sm:$0xff]  }
 0x32d   :  { %v1438_v10 = vpop.f32.mrb[15].mxu1  ;;  %v1699_v7 = vld [vmem:[#allocation14 + $0x10] sm:$0xff]  }
 0x32e   :  { %v1439_v11 = vadd.f32 %v1438_v10, %v1437_v9  ;;  %v546_v52 = vadd.f32 %v1436_v8, %v1353_v35  ;;  %v1700_v8 = vld [vmem:[#allocation14 + $0x58] sm:$0xff]   ;;  %v1702_v10 = vld [vmem:[#allocation14 + $0x60] sm:$0xff]  }
 0x32f   :  { %v1701_v9 = vld [vmem:[#allocation14 + $0x18] sm:$0xff]  }
 0x330   :  { %v549_v55 = vadd.f32 %v1439_v11, %v1353_v35  ;;  %v1703_v11 = vld [vmem:[#allocation14 + $0x20] sm:$0xff]  }
 0x332   :  { %v596_v12 = vpop.f32.mrb[16].mxu1 }
 0x333   :  { %v1572_v13 = vpop.f32.mrb[17].mxu1  ;;  %v644_v15 = vmul.f32 %v596_v12, %v552_v61 }
 0x334   :  { %v599_v14 = vpop.f32.mrb[18].mxu1  ;;  %v1705_v13 = vld [vmem:[#allocation14 + $0x28] sm:$0xff]  }
 0x335   :  { %v645_v18 = vmul.f32 %v599_v14, %v553_v60  ;;  %v648_v21 = vpack.c.bf16 %v599_v14, %v596_v12  ;;  %v1573_v23 = vpop.f32.mrb[19].mxu1  ;;  %v1704_v12 = vld [vmem:[#allocation14 + $0x68] sm:$0xff]   ;;  %v1706_v14 = vld [vmem:[#allocation14 + $0x70] sm:$0xff]  }
 0x337   :  { %v649_v24 = vpack.c.bf16 %v645_v18, %v644_v15  ;;  %v1707_v15 = vld [vmem:[#allocation14 + $0x30] sm:$0xff]   ;;  %v1708_v18 = vld [vmem:[#allocation14 + $0x78] sm:$0xff]  }
 0x339   :  { %684 = vmatprep.mubr.bf16.mxu1 %v649_v24 }
 0x33a   :  { %v637_v26 = vpop.f32.mrb[20].mxu1  ;;  %685 = vmatmul.mubr.bf16.vlgmr.msra.gmra.mrb[24].mxu1 %v648_v21  ;;  %v1709_v21 = vld [vmem:[#allocation14 + $0x38] sm:$0xff]  }
 0x33b   :  { %v1578_v27 = vpop.f32.mrb[21].mxu1  ;;  %v646_v29 = vmul.f32 %v637_v26, %v554_v56 }
 0x33c   :  { %v640_v28 = vpop.f32.mrb[22].mxu1 }
 0x33d   :  { %v647_v30 = vmul.f32 %v640_v28, %v555_v57  ;;  %v650_v31 = vpack.c.bf16 %v640_v28, %v637_v26  ;;  %v1579_v32 = vpop.f32.mrb[23].mxu1 }
 0x33f   :  { %v651_v33 = vpack.c.bf16 %v647_v30, %v646_v29 }
 0x341   :  { %692 = vmatprep.mubr.bf16.mxu1 %v651_v33 }
 0x342   :  { %693 = vmatmul.mubr.bf16.gmra.mrb[28].mxu1 %v650_v31 }
 0x343   :  { %1594 = vmatprep.mubr.msk.bf16.mxu1 %vm1978_vm0, %v1977_v1 }
 0x40d   :  { %v1460_v34 = vpop.f32.mrb[24].mxu1 }
 0x40e   :  { %v1461_v36 = vpop.f32.mrb[25].mxu1 }
 0x40f   :  { %v1462_v37 = vadd.f32 %v1461_v36, %v1460_v34  ;;  %v1463_v38 = vpop.f32.mrb[26].mxu1 }
 0x410   :  { %v1464_v39 = vpop.f32.mrb[27].mxu1 }
 0x411   :  { %v687_v41 = vadd.f32 %v1462_v37, %v1353_v35  ;;  %v1465_v42 = vadd.f32 %v1464_v39, %v1463_v38 }
 0x413   :  { %v2238_v44 = vadd.f32 %v687_v41, %v538_v40  ;;  %v690_v45 = vadd.f32 %v1465_v42, %v1353_v35 }
 0x415   :  { %v2240_v46 = vadd.f32 %v690_v45, %v541_v43  ;;  %v1466_v47 = vpop.f32.mrb[28].mxu1  ;;  %v705_v63 = vmax.f32 %v2238_v44, 0.0 }
 0x416   :  { %v1467_v48 = vpop.f32.mrb[29].mxu1 }
 0x417   :  { %v1468_v49 = vadd.f32 %v1467_v48, %v1466_v47  ;;  %v1469_v50 = vpop.f32.mrb[30].mxu1  ;;  %v706_v61 = vmax.f32 %v2240_v46, 0.0 }
 0x418   :  { %v1470_v51 = vpop.f32.mrb[31].mxu1 }
 0x419   :  { %v695_v53 = vadd.f32 %v1468_v49, %v1353_v35  ;;  %v1471_v54 = vadd.f32 %v1470_v51, %v1469_v50  ;;  %v742_v2 = vpack.c.bf16 %v706_v61, %v705_v63 }
 0x41b   :  { %v703_v56 = vadd.f32 %v695_v53, %v546_v52  ;;  %v698_v57 = vadd.f32 %v1471_v54, %v1353_v35 }
 0x41d   :  { %v2242_v58 = vadd.f32 %v698_v57, %v549_v55  ;;  %v707_v59 = vmax.f32 %v703_v56, 0.0 }
 0x41f   :  { %v708_v60 = vmax.f32 %v2242_v58, 0.0 }
 0x421   :  { %v743_v62 = vpack.c.bf16 %v708_v60, %v707_v59 }
 0x423   :  { %1581 = vmatpush3.bf16.msra.mxu0 %v743_v62 }
 0x424   :  { %1586 = vmatprep.subr.bf16.mxu0 %v1977_v1 }
 0x426   :  { %1583 = vmatmul.mubr.msk.bf16.vlgmr.msra.gmra.mrb[4].mxu0 %vm299_vm1, %v2186_v22 }
 0x427   :  { %1587 = vmatpush3.bf16.msra.mxu0 %v742_v2  ;;  %1588 = vmatprep.mubr.msk.bf16.mxu0 %vm1978_vm0, %v1977_v1 }
 0x428   :  { %1476 = vmatprep.subr.bf16.mxu0 %v1694_v0 }
 0x42e   :  { %1589 = vmatmul.mubr.msk.bf16.vlgmr.msra.gmra.mrb[8].mxu0 %vm299_vm1, %v2201_v25 }
 0x42f   :  { %1477 = vmatpush3.bf16.msra.mxu0 %v1695_v3 }
 0x430   :  { %1478 = vmatprep.subr.bf16.mxu0 %v1696_v4 }
 0x433   :  { %1479 = vmatpush3.bf16.msra.mxu0 %v1697_v5 }
 0x434   :  { %1480 = vmatprep.subr.bf16.mxu0 %v1698_v6 }
 0x437   :  { %1481 = vmatpush3.bf16.msra.mxu0 %v1699_v7 }
 0x438   :  { %1482 = vmatprep.subr.bf16.mxu0 %v1700_v8 }
 0x43b   :  { %1483 = vmatpush3.bf16.msra.mxu0 %v1701_v9 }
 0x43c   :  { %1484 = vmatprep.subr.bf16.mxu0 %v1702_v10 }
 0x43f   :  { %1485 = vmatpush3.bf16.msra.mxu0 %v1703_v11 }
 0x440   :  { %1486 = vmatprep.subr.bf16.mxu0 %v1704_v12 }
 0x443   :  { %1487 = vmatpush3.bf16.msra.mxu0 %v1705_v13 }
 0x444   :  { %1488 = vmatprep.subr.bf16.mxu0 %v1706_v14 }
 0x447   :  { %1489 = vmatpush3.bf16.msra.mxu0 %v1707_v15 }
 0x448   :  { %1490 = vmatprep.subr.bf16.mxu0 %v1708_v18 }
 0x44b   :  { %1491 = vmatpush3.bf16.msra.mxu0 %v1709_v21 }
 0x44c   :  { %1508 = vmatprep.subr.bf16.mxu0 %v1694_v0 }
 0x4f9   :  { %v778_v23 = vpop.f32.mrb[4].mxu0 }
 0x4fa   :  { %v1584_v24 = vpop.f32.mrb[5].mxu0  ;;  %v826_v27 = vmul.f32 %v778_v23, %v705_v63 }
 0x4fb   :  { %v781_v26 = vpop.f32.mrb[6].mxu0 }
 0x4fc   :  { %v827_v28 = vmul.f32 %v781_v26, %v706_v61  ;;  %v830_v29 = vpack.c.bf16 %v781_v26, %v778_v23  ;;  %v1585_v30 = vpop.f32.mrb[7].mxu0  ;;  %v985_v44 = vadd.f32 %v826_v27, %v778_v23 }
 0x4fe   :  { %v831_v31 = vpack.c.bf16 %v827_v28, %v826_v27  ;;  %v986_v42 = vadd.f32 %v827_v28, %v781_v26 }
 0x500   :  { %968 = vmatprep.mubr.bf16.mxu0 %v831_v31  ;;  %v993_v45 = vpack.c.bf16 %v986_v42, %v985_v44 }
 0x501   :  { %v819_v32 = vpop.f32.mrb[8].mxu0  ;;  %969 = vmatmul.mubr.bf16.vlgmr.msra.gmra.mrb[12].mxu0 %v830_v29 }
 0x502   :  { %v828_v33 = vmul.f32 %v819_v32, %v707_v59  ;;  %v1590_v34 = vpop.f32.mrb[9].mxu0  ;;  %1509 = vmatpush3.bf16.msra.mxu0 %v1695_v3 }
 0x503   :  { %v822_v35 = vpop.f32.mrb[10].mxu0  ;;  %1510 = vmatprep.subr.bf16.mxu0 %v1696_v4 }
 0x504   :  { %v829_v36 = vmul.f32 %v822_v35, %v708_v60  ;;  %v832_v37 = vpack.c.bf16 %v822_v35, %v819_v32  ;;  %v1591_v38 = vpop.f32.mrb[11].mxu0  ;;  %v987_v39 = vadd.f32 %v828_v33, %v819_v32 }
 0x506   :  { %v988_v40 = vadd.f32 %v829_v36, %v822_v35  ;;  %v833_v41 = vpack.c.bf16 %v829_v36, %v828_v33  ;;  %1511 = vmatpush3.bf16.msra.mxu0 %v1697_v5 }
 0x507   :  { %1512 = vmatprep.subr.bf16.mxu0 %v1698_v6 }
 0x508   :  { %v994_v43 = vpack.c.bf16 %v988_v40, %v987_v39  ;;  %976 = vmatprep.mubr.bf16.mxu0 %v833_v41 }
 0x509   :  { %977 = vmatmul.mubr.bf16.gmra.mrb[16].mxu0 %v832_v37 }
 0x50a   :  { %1593 = vmatpush3.bf16.msra.mxu1 %v994_v43  ;;  %1513 = vmatpush3.bf16.msra.mxu0 %v1699_v7 }
 0x50b   :  { %1598 = vmatprep.subr.bf16.mxu1 %v1977_v1  ;;  %1514 = vmatprep.subr.bf16.mxu0 %v1700_v8 }
 0x50d   :  { %1595 = vmatmul.mubr.msk.bf16.vlgmr.msra.gmra.mrb[32].mxu1 %vm299_vm1, %v2186_v22 }
 0x50e   :  { %1599 = vmatpush3.bf16.msra.mxu1 %v993_v45  ;;  %1600 = vmatprep.mubr.msk.bf16.mxu1 %vm1978_vm0, %v1977_v1 }
 0x50f   :  { %1515 = vmatpush3.bf16.msra.mxu0 %v1701_v9  ;;  %v1374_v9 = vld [vmem:[%s2367_s11] ss:$0 sm:$0xff]  ;;  %s2268_s11 = smov 0.0  }
 0x510   :  { %1516 = vmatprep.subr.bf16.mxu0 %v1702_v10 }
 0x513   :  { %1517 = vmatpush3.bf16.msra.mxu0 %v1703_v11 }
 0x514   :  { %1518 = vmatprep.subr.bf16.mxu0 %v1704_v12 }
 0x515   :  { %1601 = vmatmul.mubr.msk.bf16.vlgmr.msra.gmra.mrb[36].mxu1 %vm299_vm1, %v2201_v25 }
 0x517   :  { %1519 = vmatpush3.bf16.msra.mxu0 %v1705_v13 }
 0x518   :  { %1520 = vmatprep.subr.bf16.mxu0 %v1706_v14 }
 0x51b   :  { %1521 = vmatpush3.bf16.msra.mxu0 %v1707_v15 }
 0x51c   :  { %1522 = vmatprep.subr.bf16.mxu0 %v1708_v18 }
 0x51f   :  { %1523 = vmatpush3.bf16.msra.mxu0 %v1709_v21 }
 0x5d4   :  { %v1492_v46 = vpop.f32.mrb[12].mxu0 }
 0x5d5   :  { %v1493_v47 = vpop.f32.mrb[13].mxu0 }
 0x5d6   :  { %v1494_v48 = vadd.f32 %v1493_v47, %v1492_v46  ;;  %v1495_v22 = vpop.f32.mrb[14].mxu0 }
 0x5d7   :  { %v1496_v49 = vpop.f32.mrb[15].mxu0 }
 0x5d8   :  { %v1497_v50 = vadd.f32 %v1496_v49, %v1495_v22  ;;  %v971_v14 = vadd.f32 %v1494_v48, %v1374_v9 }
 0x5da   :  { %v974_v21 = vadd.f32 %v1497_v50, %v1374_v9 }
 0x5dc   :  { %v1498_v51 = vpop.f32.mrb[16].mxu0 }
 0x5dd   :  { %v1499_v1 = vpop.f32.mrb[17].mxu0 }
 0x5de   :  { %v1500_v52 = vadd.f32 %v1499_v1, %v1498_v51  ;;  %v1501_v53 = vpop.f32.mrb[18].mxu0 }
 0x5df   :  { %v1502_v54 = vpop.f32.mrb[19].mxu0 }
 0x5e0   :  { %v1503_v55 = vadd.f32 %v1502_v54, %v1501_v53  ;;  %v1029_v56 = vpop.f32.mrb[32].mxu1  ;;  %v979_v35 = vadd.f32 %v1500_v52, %v1374_v9 }
 0x5e1   :  { %v1596_v57 = vpop.f32.mrb[33].mxu1  ;;  %v1077_v58 = vmul.f32 %v1029_v56, %v985_v44 }
 0x5e2   :  { %v1032_v25 = vpop.f32.mrb[34].mxu1 }
 0x5e3   :  { %v1078_v59 = vmul.f32 %v1032_v25, %v986_v42  ;;  %v1081_v60 = vpack.c.bf16 %v1032_v25, %v1029_v56  ;;  %v1597_v61 = vpop.f32.mrb[35].mxu1 }
 0x5e5   :  { %v1082_v62 = vpack.c.bf16 %v1078_v59, %v1077_v58 }
 0x5e7   :  { %1117 = vmatprep.mubr.bf16.mxu0 %v1082_v62 }
 0x5e8   :  { %v1070_v63 = vpop.f32.mrb[36].mxu1  ;;  %1118 = vmatmul.mubr.bf16.vlgmr.msra.gmra.mrb[20].mxu0 %v1081_v60 }
 0x5e9   :  { %v1602_v0 = vpop.f32.mrb[37].mxu1  ;;  %v1079_v3 = vmul.f32 %v1070_v63, %v987_v39  ;;  %v982_v39 = vadd.f32 %v1503_v55, %v1374_v9 }
 0x5ea   :  { %v1073_v2 = vpop.f32.mrb[38].mxu1 }
 0x5eb   :  { %v1080_v4 = vmul.f32 %v1073_v2, %v988_v40  ;;  %v1083_v5 = vpack.c.bf16 %v1073_v2, %v1070_v63  ;;  %v1603_v6 = vpop.f32.mrb[39].mxu1 }
 0x5ed   :  { %v1084_v7 = vpack.c.bf16 %v1080_v4, %v1079_v3 }
 0x5ef   :  { %1125 = vmatprep.mubr.bf16.mxu0 %v1084_v7 }
 0x5f0   :  { %1126 = vmatmul.mubr.bf16.gmra.mrb[24].mxu0 %v1083_v5 }
 0x6bb   :  { %v1524_v8 = vpop.f32.mrb[20].mxu0 }
 0x6bc   :  { %v1525_v10 = vpop.f32.mrb[21].mxu0 }
 0x6bd   :  { %v1526_v11 = vadd.f32 %v1525_v10, %v1524_v8  ;;  %v1527_v12 = vpop.f32.mrb[22].mxu0 }
 0x6be   :  { %v1528_v13 = vpop.f32.mrb[23].mxu0 }
 0x6bf   :  { %v1120_v15 = vadd.f32 %v1526_v11, %v1374_v9  ;;  %v1529_v18 = vadd.f32 %v1528_v13, %v1527_v12 }
 0x6c1   :  { %v1134_v23 = vadd.f32 %v1120_v15, %v971_v14  ;;  %v1123_v24 = vadd.f32 %v1529_v18, %v1374_v9 }
 0x6c3   :  { %v1138_v26 = vmax.f32 %v1134_v23, 0.0  ;;  %v1135_v27 = vadd.f32 %v1123_v24, %v974_v21  ;;  %v1530_v28 = vpop.f32.mrb[24].mxu0 }
 0x6c4   :  { %v1531_v29 = vpop.f32.mrb[25].mxu0 }
 0x6c5   :  { %v1142_v30 = vadd.f32 %v1138_v26, %v2177_v19  ;;  %v1139_v31 = vmax.f32 %v1135_v27, 0.0  ;;  %v1532_v32 = vadd.f32 %v1531_v29, %v1530_v28  ;;  %v1533_v33 = vpop.f32.mrb[26].mxu0 }
 0x6c6   :  { %v1534_v34 = vpop.f32.mrb[27].mxu0 }
 0x6c7   :  { %1146 = vst [vmem:[#allocation15] sm:$0xff] %v1142_v30  ;;  %v1143_v36 = vadd.f32 %v1139_v31, %v2179_v20  ;;  %v1128_v37 = vadd.f32 %v1532_v32, %v1374_v9  ;;  %v1535_v38 = vadd.f32 %v1534_v34, %v1533_v33 }
 0x6c9   :  { %1147 = vst [vmem:[#allocation15 + $0x8] sm:$0xff] %v1143_v36  ;;  %v1136_v40 = vadd.f32 %v1128_v37, %v979_v35  ;;  %v1131_v41 = vadd.f32 %v1535_v38, %v1374_v9 }
 0x6cb   :  { %v1140_v42 = vmax.f32 %v1136_v40, 0.0  ;;  %v1137_v43 = vadd.f32 %v1131_v41, %v982_v39 }
 0x6cd   :  { %v1144_v44 = vadd.f32 %v1140_v42, %v2173_v16  ;;  %v1141_v45 = vmax.f32 %v1137_v43, 0.0 }
 0x6cf   :  { %1148 = vst [vmem:[#allocation16] sm:$0xff] %v1144_v44  ;;  %v1145_v19 = vadd.f32 %v1141_v45, %v2175_v17 }
 0x6d1   :  { %1149 = vst [vmem:[#allocation16 + $0x8] sm:$0xff] %v1145_v19 }
 0x6d2 LB: > { %s1157_s0 = sld [smem:[#allocation2 + %s1956_s29]]  ;;  %s1158_s2 = sshra.s32 %s1956_s29, 7  ;;  %vm1171_vm2 = vcmask 1040384   ;;  %s1956_s29 = sphi %s2270_s29, %s1155_s29   ;;  %s1952_s11 = sphi %s2268_s11, %s2374_s11  }
 0x6d3   : > { %s1395_s25 = sshll.u32 %s1158_s2, 7  ;;  %s1163_s15 = sand.u32 127, %s1956_s29 }
 0x6d4   : > { %s1396_s17 = sadd.s32 128, %s1395_s25  ;;  %s1155_s29 = sadd.s32 1, %s1956_s29  }
 0x6d5   : > { %s1164_s18 = sadd.s32 %s1396_s17, %s1163_s15  ;;  %p1152_p7 = scmp.ge.s32.totalorder %s1155_s29, 8  }
 0x6d6   : > { %s1165_s19 = sld [smem:[#allocation2 + %s1164_s18]]  ;;  %s2292_s7 = smov (%p1152_p7), 0.0  }
 0x6d7   :  { %s2294_s5 = smov (%p1152_p7), 0  }
 0x6d8   : > { %s1166_s16 = scalar_lea.vmem [#allocation15], %s1157_s0 }
 0x6d9   : > { %v1167_v16 = vld [vmem:[%s1166_s16] sm:$0x1] }
 0x6dc   : > { %s1168_s20 = scalar_lea.vmem [#allocation16], %s1165_s19 }
 0x6dd   : > { %v1169_v17 = vld [vmem:[%s1168_s20] sm:$0x1] }
 0x6de   : > { %v1170_v20 = vmul.f32 %v1169_v17, %v1167_v16 }
 0x6e0   : > { %v1172_v46 = vsel %vm1171_vm2, %v1170_v20, 0.0 }
 0x6e1   : > { %1173 = vadd.xlane.f32.xlu0 %v1172_v46 }
 0x76e   : > { %v1174_v47 = vpop.xlane.xlu0 %1173 }
 0x76f   : > { %v1175_v48 = vrot.slane %v1174_v47, 4 }
 0x771   : > { %v1176_v22 = vadd.f32 %v1175_v48, %v1174_v47 }
 0x773   : > { %v1177_v49 = vrot.slane %v1176_v22, 2 }
 0x775   : > { %v1178_v50 = vadd.f32 %v1177_v49, %v1176_v22 }
 0x777   : > { %v1179_v51 = vrot.slane %v1178_v50, 1 }
 0x779   : > { %v1180_v1 = vadd.f32 %v1179_v51, %v1178_v50 }
 0x77b   : > { %1604 = vpush %v1180_v1 }
 0x7ac   : > { %s1605_s21 = spop %1604 }
 0x7ad   : > { %s1182_s22 = sand.u32 2147483647, %s1605_s21  ;;  %p1188_p6 = scmp.ge.f32.partialorder %s1605_s21, 0.0 }
 0x7ae   : > { %s1183_s8 = ssub.f32 0.0, %s1182_s22 }
 0x7b0   : > { %v1184_v52 = vstv %s1183_s8 }
 0x7b1   : > { %v1185_v53 = vmul.f32 1.442695, %v1184_v52 }
 0x7b3   : > { %1710 = vpow2.f32 %v1185_v53 }
 0x7bd   : > { %v1711_v54 = vpop.eup %1710 }
 0x7be   : > { %1606 = vpush %v1711_v54 }
 0x7ef   : > { %s1607_s28 = spop %1606 }
 0x7f0   : > { %s1189_s6 = sadd.f32 1.0, %s1607_s28 }
 0x7f2   : > { %v1190_v55 = vstv %s1189_s6 }
 0x7f3   : > { %1712 = vrcp.f32 %v1190_v55 }
 0x7fd   : > { %v1713_v56 = vpop.eup %1712 }
 0x7fe   : > { %1608 = vpush %v1713_v56 }
 0x82f   : > { %s1609_s14 = spop %1608 }
 0x830   : > { %s1196_s10 = smul.f32 %s1609_s14, %s1607_s28 }
 0x832   : > { %s2378_s14 = smov (!%p1188_p6, %s1609_s14), %s1196_s10 }
 0x833   : > { %s1198_s1 = sadd.f32 1e-15, %s2378_s14 }
 0x835   : > { %v1199_v57 = vstv %s1198_s1 }
 0x836   : > { %1714 = vlog2.f32 %v1199_v57 }
 0x840   : > { %v1715_v25 = vpop.eup %1714 }
 0x841   : > { %v1201_v58 = vmul.f32 0.6931472, %v1715_v25 }
 0x843   : > { %1610 = vpush %v1201_v58 }
 0x872   :  { %1154 = sbr.rel (!%p1152_p7) target bundleno = 1746 (0x6d2), region = 130 }
 0x874   : > { %s1611_s30 = spop %1610 }
 0x875   : > { %s2283_s11 = ssub.f32 %s1952_s11, %s1611_s30  }
 0x877   : > { %s2373_s3 = smov %s2283_s11 }
 0x878   : > { %s2374_s11 = smov %s2373_s3  ;;  %s1206_s4 = smul.f32 (%p1152_p7), 0.125, %s2373_s3 }
 0x879 LB: > { %s1214_s26 = sld [smem:[#allocation7 + %s1964_s5]]  ;;  %s1215_s9 = sshra.s32 %s1964_s5, 7  ;;  %s1964_s5 = sphi %s2294_s5, %s1212_s5   ;;  %s1960_s7 = sphi %s2292_s7, %s2375_s7  }
 0x87a   : > { %s1397_s27 = sshll.u32 %s1215_s9, 7  ;;  %s1220_s11 = sand.u32 127, %s1964_s5 }
 0x87b   : > { %s1398_s29 = sadd.s32 128, %s1397_s27  ;;  %s1212_s5 = sadd.s32 1, %s1964_s5  }
 0x87c   : > { %s1221_s0 = sadd.s32 %s1398_s29, %s1220_s11  ;;  %p1209_p9 = scmp.ge.s32.totalorder %s1212_s5, 8  }
 0x87d   : > { %s1222_s2 = sld [smem:[#allocation7 + %s1221_s0]]  ;;  %s1979_s1 = smov (%p1209_p9), [#allocation16]  }
 0x87e   :  { %s1287_s30 = sshll.u32 (%p1209_p9), %s1979_s1, 4  ;;  %s1288_s30 = int_to_ptr.vmem [resolvable:$true] %s1287_s30 }
 0x87f   : > { %s1223_s25 = scalar_lea.vmem [#allocation15], %s1214_s26  ;;  %s1854_s9 = scalar_lea.vmem (%p1209_p9), %s1288_s30, 256 }
 0x880   : > { %v1224_v59 = vld [vmem:[%s1223_s25] sm:$0x1]  ;;  %p1855_p10 = scmp.ne.s32.totalorder (%p1209_p9), %s1288_s30, %s1854_s9  ;;  %p1859_p11 = scmp.lt.s32.totalorder (%p1209_p9), %s1288_s30, %s1288_s30 }
 0x881   :  { %p1860_p12 = scmp.lt.s32.totalorder (%p1209_p9), %s1854_s9, %s1854_s9 }
 0x883   : > { %s1225_s15 = scalar_lea.vmem [#allocation16], %s1222_s2  ;;  %p1861_p13 = por (%p1209_p9), %p1860_p12, %p1859_p11 }
 0x884   : > { %v1226_v60 = vld [vmem:[%s1225_s15] sm:$0x1] }
 0x885   : > { %v1227_v61 = vmul.f32 %v1226_v60, %v1224_v59  ;;  %p1862_p0 = pnand (%p1209_p9), %p1861_p13, %p1855_p10 }
 0x887   : > { %v1229_v62 = vsel %vm1171_vm2, %v1227_v61, 0.0 }
 0x888   : > { %1230 = vadd.xlane.f32.xlu0 %v1229_v62 }
 0x915   : > { %v1231_v63 = vpop.xlane.xlu0 %1230 }
 0x916   : > { %v1232_v0 = vrot.slane %v1231_v63, 4 }
 0x918   : > { %v1233_v2 = vadd.f32 %v1232_v0, %v1231_v63 }
 0x91a   : > { %v1234_v3 = vrot.slane %v1233_v2, 2 }
 0x91c   : > { %v1235_v4 = vadd.f32 %v1234_v3, %v1233_v2 }
 0x91e   : > { %v1236_v5 = vrot.slane %v1235_v4, 1 }
 0x920   : > { %v1237_v6 = vadd.f32 %v1236_v5, %v1235_v4 }
 0x922   : > { %1612 = vpush %v1237_v6 }
 0x953   : > { %s1613_s17 = spop %1612 }
 0x954   : > { %s1239_s18 = sand.u32 2147483647, %s1613_s17  ;;  %p1245_p8 = scmp.ge.f32.partialorder %s1613_s17, 0.0 }
 0x955   : > { %s1240_s19 = ssub.f32 0.0, %s1239_s18 }
 0x957   : > { %v1241_v7 = vstv %s1240_s19 }
 0x958   : > { %v1242_v8 = vmul.f32 1.442695, %v1241_v7 }
 0x95a   : > { %1716 = vpow2.f32 %v1242_v8 }
 0x964   : > { %v1717_v9 = vpop.eup %1716 }
 0x965   : > { %1614 = vpush %v1717_v9 }
 0x996   : > { %s1615_s16 = spop %1614 }
 0x997   : > { %s1246_s20 = sadd.f32 1.0, %s1615_s16 }
 0x999   : > { %v1247_v10 = vstv %s1246_s20 }
 0x99a   : > { %1718 = vrcp.f32 %v1247_v10 }
 0x9a4   : > { %v1719_v11 = vpop.eup %1718 }
 0x9a5   : > { %1616 = vpush %v1719_v11 }
 0x9d6   : > { %s1617_s21 = spop %1616 }
 0x9d7   : > { %s1253_s22 = smul.f32 %s1617_s21, %s1615_s16 }
 0x9d9   : > { %s2380_s21 = smov (!%p1245_p8, %s1617_s21), %s1253_s22 }
 0x9da   : > { %s1255_s8 = ssub.f32 1.0, %s2380_s21 }
 0x9dc   : > { %s1256_s28 = sadd.f32 1e-15, %s1255_s8 }
 0x9de   : > { %v1257_v12 = vstv %s1256_s28 }
 0x9df   : > { %1720 = vlog2.f32 %v1257_v12 }
 0x9e9   : > { %v1721_v13 = vpop.eup %1720 }
 0x9ea   : > { %v1259_v14 = vmul.f32 0.6931472, %v1721_v13 }
 0x9ec   : > { %1618 = vpush %v1259_v14 }
 0xa1a   :  { %1211 = sbr.rel (!%p1209_p9) target bundleno = 2169 (0x879), region = 141 }
 0xa1d   : > { %s1619_s6 = spop %1618 }
 0xa1e   : > { %s1261_s14 = ssub.f32 %s1960_s7, %s1619_s6  }
 0xa20   : > { %s2375_s7 = smov %s1261_s14  ;;  %s1264_s10 = smul.f32 (%p1209_p9), 0.125, %s1261_s14 }
 0xa22   :  { %s1265_s26 = sadd.f32 %s1264_s10, %s1206_s4 }
 0xa23   :  { %1865 = shalt.err (!%p1862_p0)
}
 0xa24   :  { %s1866_s29 = scalar_lea.hbm %s2369_s13, 256 }
 0xa25   :  { %p1867_p1 = scmp.ne.s32.totalorder %s2369_s13, %s1866_s29  ;;  %p1870_p2 = scmp.lt.u32.totalorder %s1866_s29, %s2369_s13 }
 0xa27   :  { %p1872_p3 = pnand %p1870_p2, %p1867_p1 }
 0xa29   :  { %1875 = shalt.err (!%p1872_p3)
}
 0xa2a   :  { %1293 = dma.vmem_to_hbm [thread:$0]  %s1288_s30, 256, %s2369_s13, [#allocation17], %s1967_s23, %s1967_s23, %s1968_s24   ;;  %vm1268_vm3 = vcmask 0  }
 0xa2b   :  { %s1266_s25 = smul.f32 0.5, %s1265_s26  ;;  %s1980_s15 = smov [#allocation15]  }
 0xa2c   :  { %s1275_s17 = sshll.u32 %s1980_s15, 4  ;;  %s1981_s18 = smov [#allocation18]   ;;  %s1276_s17 = int_to_ptr.vmem [resolvable:$true] %s1275_s17 }
 0xa2d   :  { %v1267_v15 = vstv %s1266_s25  ;;  %s1300_s19 = sshll.u32 %s1981_s18, 4  ;;  %s1876_s16 = scalar_lea.vmem %s1276_s17, 256  ;;  %s1301_s19 = int_to_ptr.vmem [resolvable:$true] %s1300_s19 }
 0xa2e   :  { %1269 = vst.msk [vmem:[#allocation18] sm:$0x1] %vm1268_vm3, %v1267_v15  ;;  %p1877_p4 = scmp.ne.s32.totalorder %s1276_s17, %s1876_s16  ;;  %p1881_p5 = scmp.lt.s32.totalorder %s1276_s17, %s1276_s17 }
 0xa2f   :  { %p1882_p6 = scmp.lt.s32.totalorder %s1876_s16, %s1876_s16 }
 0xa31   :  { %p1883_p7 = por %p1882_p6, %p1881_p5 }
 0xa33   :  { %p1884_p8 = pnand %p1883_p7, %p1877_p4 }
 0xa35   :  { %1887 = shalt.err (!%p1884_p8)
}
 0xa36   :  { %s1888_s13 = scalar_lea.hbm %s2368_s12, 256 }
 0xa37   :  { %p1889_p9 = scmp.ne.s32.totalorder %s2368_s12, %s1888_s13  ;;  %p1892_p10 = scmp.lt.u32.totalorder %s1888_s13, %s2368_s12 }
 0xa39   :  { %p1894_p11 = pnand %p1892_p10, %p1889_p9 }
 0xa3b   :  { %1897 = shalt.err (!%p1894_p11)
}
 0xa3c   :  { %1281 = dma.vmem_to_hbm [thread:$0]  %s1276_s17, 256, %s2368_s12, [#allocation4], %s1967_s23, %s1967_s23, %s1968_s24  }
 0xa3d   :  { %s1898_s1 = scalar_lea.vmem %s1301_s19, 16  ;;  %s1902_s30 = scalar_lea.vmem %s1301_s19, 32 }
 0xa3e   :  { %p1899_p12 = scmp.ne.s32.totalorder %s1301_s19, %s1898_s1  ;;  %p1903_p13 = scmp.lt.s32.totalorder %s1301_s19, %s1301_s19 }
 0xa3f   :  { %p1904_p0 = scmp.lt.s32.totalorder %s1902_s30, %s1898_s1 }
 0xa41   :  { %p1905_p1 = por %p1904_p0, %p1903_p13 }
 0xa43   :  { %p1906_p2 = pnand %p1905_p1, %p1899_p12 }
 0xa45   :  { %1909 = shalt.err (!%p1906_p2)
}
 0xa46   :  { %s2376_s27 = sld [smem:[#allocation26_spill]] }
 0xa4c   :  { %s1910_s11 = scalar_lea.hbm %s2376_s27, 16 }
 0xa4d   :  { %p1911_p3 = scmp.ne.s32.totalorder %s2376_s27, %s1910_s11  ;;  %p1914_p4 = scmp.lt.u32.totalorder %s1910_s11, %s2376_s27 }
 0xa4f   :  { %p1916_p5 = pnand %p1914_p4, %p1911_p3 }
 0xa51   :  { %1919 = shalt.err (!%p1916_p5)
}
 0xa52   :  { %1303 = dma.vmem_to_hbm [thread:$0]  %s1301_s19, 16, %s2376_s27, [#allocation17]  }
 0xa53   :  { %1946 = dma.done.wait [#allocation4], 256  }
 0xa54   :  { %1947 = vsyncadd [#allocation4], 4294967040 }
 0xa55   :  { %1948 = dma.done.wait [#allocation17], 272  }
 0xa56   :  { %1949 = vsyncadd [#allocation17], 4294967024 }
 0xa57   :  { %1313 = vsyncpa [#allocation3], 1 }
 0xa58   :  { %1314 = vsyncpa [#allocation10], 1 }
 0xa59   :  { %1315 = vsyncpa [#allocation13], 1 }
 0xa5a   :  { %1316 = vsyncpa [#allocation4], 1 }
 0xa5b   :  { %1317 = vsyncpa [#allocation17], 1 }
 0xa5c   :  { %1318 = vsyncpa [#allocation5], 1 }
 0xa5d   :  { %1319 = vsyncpa [#allocation6], 1 }

</bundles_post_ra>
